<compile_context>
chip_gen: v7x
topology: tpu7x:2x2x1
jax: 0.10.0
libtpu: 0.0.40
codegen_flags: <defaults>
</compile_context>

<pallas_src>
import math
import numpy as np
import jax
import jax.numpy as jnp
from jax.experimental import pallas as pl
from jax.experimental.pallas import tpu as pltpu


# ----------------------------------------------------------------------------
# Fused kernel: grid axis 0 = reverse-time step s (s = 0 <-> t = T-1).
#   eps   = tanh(x @ W1 + temb[s]) @ W2          (stand-in eps network, MXU)
#   x0    = clip((x - eps * c_eps) * c_inv_sqrt, -1, 1)
#   x'    = c_x * x + c_x0 * x0 + c_noise * noise[s]
# Coefficient table (SMEM, per reversed step s):
#   [0] sqrt(1 - alcps_t)
#   [1] 1 / sqrt(alcps_t)
#   [2] sqrt(alpha_t) * (1 - alcps_prev) / (1 - alcps_t)
#   [3] sqrt(alcps_prev) * beta_t / (1 - alcps_t)
#   [4] sqrt(beta_t) if t > 0 else 0
# ----------------------------------------------------------------------------
def fused_diffusion_kernel(coef_ref, x_init_ref, w1_ref, w2_ref, temb_ref,
                           noise_ref, o_ref, x_scr):
    s = pl.program_id(0)

    # Load x_T into the resident f32 state on the first step.
    @pl.when(s == 0)
    def _():
        x_scr[...] = x_init_ref[...]

    x = x_scr[...]                                            # f32 (R, S)

    # --- stand-in eps predictor: bf16 MXU path, f32 accumulation ------------
    h = jnp.tanh(
        jnp.dot(x.astype(jnp.bfloat16), w1_ref[...],
                preferred_element_type=jnp.float32)
        + temb_ref[0]                                         # (1, S) broadcast
    )
    eps = jnp.dot(h.astype(jnp.bfloat16), w2_ref[...],
                  preferred_element_type=jnp.float32)

    # --- DDPM reverse step epilogue (f32, divides pre-folded host-side) -----
    c_eps = coef_ref[s, 0]
    c_inv_sqrt = coef_ref[s, 1]
    c_x = coef_ref[s, 2]
    c_x0 = coef_ref[s, 3]
    c_noise = coef_ref[s, 4]

    x0 = jnp.clip((x - eps * c_eps) * c_inv_sqrt, -1.0, 1.0)
    x_new = c_x * x + c_x0 * x0 + c_noise * noise_ref[0]
    x_scr[...] = x_new

    @pl.when(s == pl.num_programs(0) - 1)
    def _():
        o_ref[...] = x_new


# ----------------------------------------------------------------------------
# Glue: schedule, coefficient folding, time embeddings, single pallas_call
# ----------------------------------------------------------------------------
def run_diffusion(key, *, batch=8, channels=3, image_size=16, time_range=8):
    n_rows = batch * channels          # sublane axis (multiple of 8)
    n_cols = image_size * image_size   # lane axis   (multiple of 128)

    # Noise schedule (same as the PyTorch module), coefficients pre-folded so
    # the kernel epilogue has no divides.  Row s corresponds to t = T-1-s.
    betas = np.linspace(0.0001, 0.02, time_range, dtype=np.float64)
    alphas = 1.0 - betas
    alcps = np.cumprod(alphas)

    coefs = np.zeros((time_range, 8), np.float32)
    for s in range(time_range):
        t = time_range - 1 - s
        alcps_prev = 1.0 if t == 0 else alcps[t - 1]
        one_m_alcps = 1.0 - alcps[t]
        coefs[s, 0] = math.sqrt(1.0 - alcps[t])
        coefs[s, 1] = 1.0 / math.sqrt(alcps[t])
        coefs[s, 2] = math.sqrt(alphas[t]) * (1.0 - alcps_prev) / one_m_alcps
        coefs[s, 3] = math.sqrt(alcps_prev) * betas[t] / one_m_alcps
        coefs[s, 4] = math.sqrt(betas[t]) if t > 0 else 0.0
    coefs = jnp.asarray(coefs)

    # Sinusoidal time embeddings for all reversed steps, shape (T, 1, S).
    half = n_cols // 2
    freqs = np.exp(-math.log(10000.0) * np.arange(half, dtype=np.float64) / half)
    t_rev = np.arange(time_range - 1, -1, -1, dtype=np.float64)
    args = t_rev[:, None] * freqs[None, :]
    temb = np.concatenate([np.cos(args), np.sin(args)], axis=-1).astype(np.float32)
    temb = jnp.asarray(temb[:, None, :])                       # (T, 1, S)

    # Deterministic stand-in eps-network weights (bf16 for the MXU path).
    kx, kw1, kw2, kn = jax.random.split(key, 4)
    w1 = (0.05 * jax.random.normal(kw1, (n_cols, n_cols), jnp.float32)
          ).astype(jnp.bfloat16)
    w2 = (0.05 * jax.random.normal(kw2, (n_cols, n_cols), jnp.float32)
          ).astype(jnp.bfloat16)

    # x_T ~ N(0, I) as the (N*C, H*W) slab, plus ALL per-step noise slabs drawn
    # once up-front (single RNG dispatch; the t=0 slab gets zero scale).
    x_init = jax.random.normal(kx, (n_rows, n_cols), jnp.float32)
    noise = jax.random.normal(kn, (time_range, n_rows, n_cols), jnp.float32)

    out2d = pl.pallas_call(
        fused_diffusion_kernel,
        out_shape=jax.ShapeDtypeStruct((n_rows, n_cols), jnp.float32),
        grid=(time_range,),
        in_specs=[
            pl.BlockSpec(memory_space=pltpu.MemorySpace.SMEM),        # coefs
            pl.BlockSpec((n_rows, n_cols), lambda s: (0, 0)),         # x_T (resident)
            pl.BlockSpec((n_cols, n_cols), lambda s: (0, 0)),         # W1  (resident)
            pl.BlockSpec((n_cols, n_cols), lambda s: (0, 0)),         # W2  (resident)
            pl.BlockSpec((1, 1, n_cols), lambda s: (s, 0, 0)),        # temb[s]
            pl.BlockSpec((1, n_rows, n_cols), lambda s: (s, 0, 0)),   # noise[s]
        ],
        out_specs=pl.BlockSpec((n_rows, n_cols), lambda s: (0, 0)),
        scratch_shapes=[pltpu.VMEM((n_rows, n_cols), jnp.float32)],   # resident x
        compiler_params=pltpu.CompilerParams(
            dimension_semantics=("arbitrary",)),
    )(coefs, x_init, w1, w2, temb, noise)

    # back to NCHW
    return out2d.reshape(batch, channels, image_size, image_size)


if __name__ == "__main__":
    key = jax.random.PRNGKey(0)
    # Small, forward-consistent shapes: batch=8 (fills MXU rows), channels=3,
    # image_size=16, time_range=8 (original uses 1/3/512 and T=1000).
    out = run_diffusion(key, batch=8, channels=3, image_size=16, time_range=8)
    out = jax.block_until_ready(out)
    assert out.shape == (8, 3, 16, 16)
    assert bool(jnp.all(jnp.isfinite(out)))
    print("KERNEL_OK")
</pallas_src>

<mosaic_0001>
module attributes {stable_mosaic.version = 11 : i64} {
  func.func @fused_diffusion_kernel(%arg0: i32, %arg1: memref<8x8xf32, #tpu.memory_space<smem>>, %arg2: memref<24x256xf32, #tpu.memory_space<vmem>>, %arg3: memref<256x256xbf16, #tpu.memory_space<vmem>>, %arg4: memref<256x256xbf16, #tpu.memory_space<vmem>>, %arg5: memref<1x1x256xf32, #tpu.memory_space<vmem>>, %arg6: memref<1x24x256xf32, #tpu.memory_space<vmem>>, %arg7: memref<24x256xf32, #tpu.memory_space<vmem>>, %arg8: memref<24x256xf32, #tpu.memory_space<vmem>>) attributes {dimension_semantics = [#tpu.dimension_semantics<arbitrary>], iteration_bounds = array<i64: 8>, scalar_prefetch = 0 : i64, scratch_operands = 1 : i64, tpu.core_type = #tpu.core_type<tc>, window_params = [{transform_indices = @transform_0, window_bounds = array<i64: 8, 8>}, {pipeline_mode = #tpu.pipeline_mode<synchronous>, transform_indices = @transform_1, window_bounds = array<i64: 24, 256>}, {pipeline_mode = #tpu.pipeline_mode<synchronous>, transform_indices = @transform_2, window_bounds = array<i64: 256, 256>}, {pipeline_mode = #tpu.pipeline_mode<synchronous>, transform_indices = @transform_3, window_bounds = array<i64: 256, 256>}, {transform_indices = @transform_4, window_bounds = array<i64: 1, 1, 256>}, {transform_indices = @transform_5, window_bounds = array<i64: 1, 24, 256>}, {pipeline_mode = #tpu.pipeline_mode<synchronous>, transform_indices = @transform_6, window_bounds = array<i64: 24, 256>}]} {
    %c0_i32 = arith.constant 0 : i32
    %0 = arith.cmpi eq, %arg0, %c0_i32 : i32
    %1 = arith.extui %0 : i1 to i32
    %c0_i32_0 = arith.constant 0 : i32
    %2 = arith.cmpi ne, %1, %c0_i32_0 : i32
    scf.if %2 {
      %c0_19 = arith.constant 0 : index
      %c0_20 = arith.constant 0 : index
      %48 = vector.load %arg2[%c0_19, %c0_20] : memref<24x256xf32, #tpu.memory_space<vmem>>, vector<24x256xf32>
      %c0_21 = arith.constant 0 : index
      %c0_22 = arith.constant 0 : index
      %49 = vector.load %arg8[%c0_21, %c0_22] : memref<24x256xf32, #tpu.memory_space<vmem>>, vector<24x256xf32>
      tpu.vector_store %arg8[%c0_21, %c0_22], %48 {strides = array<i32>} : memref<24x256xf32, #tpu.memory_space<vmem>>, vector<24x256xf32>,
    } else {
    }
    %c0 = arith.constant 0 : index
    %c0_1 = arith.constant 0 : index
    %3 = vector.load %arg8[%c0, %c0_1] : memref<24x256xf32, #tpu.memory_space<vmem>>, vector<24x256xf32>
    %4 = arith.truncf %3 : vector<24x256xf32> to vector<24x256xbf16>
    %c0_2 = arith.constant 0 : index
    %c0_3 = arith.constant 0 : index
    %5 = vector.load %arg3[%c0_2, %c0_3] : memref<256x256xbf16, #tpu.memory_space<vmem>>, vector<256x256xbf16>
    %cst = arith.constant dense<0.000000e+00> : vector<24x256xf32>
    %6 = tpu.matmul %4, %5, %cst {dimension_numbers = #tpu.dot_dimension_numbers<[1], [0], [0], [1], [0, 0, 1, 1], [], []>} : vector<24x256xbf16>, vector<256x256xbf16>, vector<24x256xf32> -> vector<24x256xf32>
    %c0_4 = arith.constant 0 : index
    %c0_5 = arith.constant 0 : index
    %c0_6 = arith.constant 0 : index
    %7 = vector.load %arg5[%c0_4, %c0_5, %c0_6] : memref<1x1x256xf32, #tpu.memory_space<vmem>>, vector<1x1x256xf32>
    %8 = vector.shape_cast %7 : vector<1x1x256xf32> to vector<1x256xf32>
    %9 = vector.broadcast %8 : vector<1x256xf32> to vector<24x256xf32>
    %10 = arith.addf %6, %9 : vector<24x256xf32>
    %11 = math.tanh %10 : vector<24x256xf32>
    %12 = arith.truncf %11 : vector<24x256xf32> to vector<24x256xbf16>
    %c0_7 = arith.constant 0 : index
    %c0_8 = arith.constant 0 : index
    %13 = vector.load %arg4[%c0_7, %c0_8] : memref<256x256xbf16, #tpu.memory_space<vmem>>, vector<256x256xbf16>
    %cst_9 = arith.constant dense<0.000000e+00> : vector<24x256xf32>
    %14 = tpu.matmul %12, %13, %cst_9 {dimension_numbers = #tpu.dot_dimension_numbers<[1], [0], [0], [1], [0, 0, 1, 1], [], []>} : vector<24x256xbf16>, vector<256x256xbf16>, vector<24x256xf32> -> vector<24x256xf32>
    %15 = arith.index_cast %arg0 : i32 to index
    %c0_10 = arith.constant 0 : index
    %16 = memref.load %arg1[%15, %c0_10] : memref<8x8xf32, #tpu.memory_space<smem>>
    %17 = arith.index_cast %arg0 : i32 to index
    %c1 = arith.constant 1 : index
    %18 = memref.load %arg1[%17, %c1] : memref<8x8xf32, #tpu.memory_space<smem>>
    %19 = arith.index_cast %arg0 : i32 to index
    %c2 = arith.constant 2 : index
    %20 = memref.load %arg1[%19, %c2] : memref<8x8xf32, #tpu.memory_space<smem>>
    %21 = arith.index_cast %arg0 : i32 to index
    %c3 = arith.constant 3 : index
    %22 = memref.load %arg1[%21, %c3] : memref<8x8xf32, #tpu.memory_space<smem>>
    %23 = arith.index_cast %arg0 : i32 to index
    %c4 = arith.constant 4 : index
    %24 = memref.load %arg1[%23, %c4] : memref<8x8xf32, #tpu.memory_space<smem>>
    %25 = vector.broadcast %16 : f32 to vector<24x256xf32>
    %26 = arith.mulf %14, %25 : vector<24x256xf32>
    %27 = arith.subf %3, %26 : vector<24x256xf32>
    %28 = vector.broadcast %18 : f32 to vector<24x256xf32>
    %29 = arith.mulf %27, %28 : vector<24x256xf32>
    %cst_11 = arith.constant -1.000000e+00 : f32
    %cst_12 = arith.constant 1.000000e+00 : f32
    %30 = vector.broadcast %cst_11 : f32 to vector<24x256xf32>
    %31 = arith.maximumf %30, %29 : vector<24x256xf32>
    %32 = vector.broadcast %cst_12 : f32 to vector<24x256xf32>
    %33 = arith.minimumf %32, %31 : vector<24x256xf32>
    %34 = vector.broadcast %20 : f32 to vector<24x256xf32>
    %35 = arith.mulf %34, %3 : vector<24x256xf32>
    %36 = vector.broadcast %22 : f32 to vector<24x256xf32>
    %37 = arith.mulf %36, %33 : vector<24x256xf32>
    %38 = arith.addf %35, %37 : vector<24x256xf32>
    %c0_13 = arith.constant 0 : index
    %c0_14 = arith.constant 0 : index
    %c0_15 = arith.constant 0 : index
    %39 = vector.load %arg6[%c0_13, %c0_14, %c0_15] : memref<1x24x256xf32, #tpu.memory_space<vmem>>, vector<1x24x256xf32>
    %40 = vector.shape_cast %39 : vector<1x24x256xf32> to vector<24x256xf32>
    %41 = vector.broadcast %24 : f32 to vector<24x256xf32>
    %42 = arith.mulf %41, %40 : vector<24x256xf32>
    %43 = arith.addf %38, %42 : vector<24x256xf32>
    %c0_16 = arith.constant 0 : index
    %c0_17 = arith.constant 0 : index
    %44 = vector.load %arg8[%c0_16, %c0_17] : memref<24x256xf32, #tpu.memory_space<vmem>>, vector<24x256xf32>
    tpu.vector_store %arg8[%c0_16, %c0_17], %43 {strides = array<i32>} : memref<24x256xf32, #tpu.memory_space<vmem>>, vector<24x256xf32>,
    %c7_i32 = arith.constant 7 : i32
    %45 = arith.cmpi eq, %arg0, %c7_i32 : i32
    %46 = arith.extui %45 : i1 to i32
    %c0_i32_18 = arith.constant 0 : i32
    %47 = arith.cmpi ne, %46, %c0_i32_18 : i32
    scf.if %47 {
      %c0_19 = arith.constant 0 : index
      %c0_20 = arith.constant 0 : index
      %48 = vector.load %arg7[%c0_19, %c0_20] : memref<24x256xf32, #tpu.memory_space<vmem>>, vector<24x256xf32>
      tpu.vector_store %arg7[%c0_19, %c0_20], %43 {strides = array<i32>} : memref<24x256xf32, #tpu.memory_space<vmem>>, vector<24x256xf32>,
    } else {
    }
    return
  }
  func.func @transform_0(%arg0: i32) -> (i32, i32) {
    %c0_i32 = arith.constant 0 : i32
    %c0_i32_0 = arith.constant 0 : i32
    %c0_i32_1 = arith.constant 0 : i32
    return %c0_i32, %c0_i32_0 : i32, i32
  }
  func.func @transform_1(%arg0: i32) -> (i32, i32) {
    %c0_i32 = arith.constant 0 : i32
    %c0_i32_0 = arith.constant 0 : i32
    %c0_i32_1 = arith.constant 0 : i32
    return %c0_i32, %c0_i32_0 : i32, i32
  }
  func.func @transform_2(%arg0: i32) -> (i32, i32) {
    %c0_i32 = arith.constant 0 : i32
    %c0_i32_0 = arith.constant 0 : i32
    %c0_i32_1 = arith.constant 0 : i32
    return %c0_i32, %c0_i32_0 : i32, i32
  }
  func.func @transform_3(%arg0: i32) -> (i32, i32) {
    %c0_i32 = arith.constant 0 : i32
    %c0_i32_0 = arith.constant 0 : i32
    %c0_i32_1 = arith.constant 0 : i32
    return %c0_i32, %c0_i32_0 : i32, i32
  }
  func.func @transform_4(%arg0: i32) -> (i32, i32, i32) {
    %c0_i32 = arith.constant 0 : i32
    %c0_i32_0 = arith.constant 0 : i32
    %c0_i32_1 = arith.constant 0 : i32
    return %arg0, %c0_i32, %c0_i32_0 : i32, i32, i32
  }
  func.func @transform_5(%arg0: i32) -> (i32, i32, i32) {
    %c0_i32 = arith.constant 0 : i32
    %c0_i32_0 = arith.constant 0 : i32
    %c0_i32_1 = arith.constant 0 : i32
    return %arg0, %c0_i32, %c0_i32_0 : i32, i32, i32
  }
  func.func @transform_6(%arg0: i32) -> (i32, i32) {
    %c0_i32 = arith.constant 0 : i32
    %c0_i32_0 = arith.constant 0 : i32
    %c0_i32_1 = arith.constant 0 : i32
    return %c0_i32, %c0_i32_0 : i32, i32
  }
}

</mosaic_0001>

<bundles_post_ra>
// kernel: tpu_custom_call.1
= control target key start
LH: loop header
LB: loop body
LE: loop exit
PB: predicated region body
PF: predicated region fallthrough
CT: control target
= control target key end

     0   :  { %s2029_s0 = inlined_call_operand.hbm [shape: f32[8,8], index: 0, kind: input, shape index: {}]   ;;  %s2030_s1 = inlined_call_operand.hbm [shape: f32[24,256], index: 1, kind: input, shape index: {}]   ;;  %s2031_s2 = inlined_call_operand.hbm [shape: bf16[256,256], index: 2, kind: input, shape index: {}]   ;;  %s2032_s3 = inlined_call_operand.hbm [shape: bf16[256,256], index: 3, kind: input, shape index: {}]   ;;  %s2033_s4 = inlined_call_operand.hbm [shape: f32[8,1,256], index: 4, kind: input, shape index: {}]   ;;  %s2034_s5 = inlined_call_operand.hbm [shape: f32[8,24,256], index: 5, kind: input, shape index: {}]   ;;  %s2035_s6 = inlined_call_operand.hbm [shape: f32[24,256], index: 6, kind: output, shape index: {}]  }
   0x1   :  { %2047 = sst [smem:[#allocation22_spill]] %s2029_s0 }
   0x2   :  { %2048 = sst [smem:[#allocation23_spill]] %s2031_s2 }
   0x3   :  { %2049 = sst [smem:[#allocation24_spill]] %s2033_s4 }
   0x4   :  { %11 = vsyncpa [#allocation6], 0 }
   0x5   :  { %12 = vsyncpa [#allocation4], 0 }
   0x6   :  { %13 = vsyncpa [#allocation9], 0 }
   0x7   :  { %14 = vsyncpa [#allocation12], 0 }
   0x8   :  { %16 = vsyncpa [#allocation12 + $0x1], 0 }
   0x9   :  { %17 = vsyncpa [#allocation5], 0  ;;  %s1689_s21 = smov 0   ;;  %s1691_s22 = smov 0  }
   0xa   :  { %s1693_s23 = smov 0   ;;  %s1695_s24 = smov 0  }
   0xb LB: > { %2050 = sst [smem:[#allocation20_spill]] %s1635_s23  ;;  %s1641_s25 = smov [#allocation8]   ;;  %s1639_s24 = sphi %s1695_s24, %s2080_s24   ;;  %s1635_s23 = sphi %s1693_s23, %s2077_s23   ;;  %s1631_s22 = sphi %s1691_s22, %s2079_s22   ;;  %s1627_s21 = sphi %s1689_s21, %s2078_s21  }
   0xc   : > { %s219_s26 = sshll.u32 %s1641_s25, 4  ;;  %s1710_s27 = sadd.s32 4294967295, %s1639_s24   ;;  %s220_s26 = int_to_ptr.vmem [resolvable:$true] %s219_s26 }
   0xd   : > { %p1103_p0 = scmp.ge.s32.totalorder %s1639_s24, 1  ;;  %p2036_p1 = scmp.eq.s32.totalorder %s1710_s27, 0 }
   0xe   : > { %p185_p2 = scmp.lt.s32.totalorder %s1639_s24, 9  ;;  %s1729_s30 = sadd.s32 1, %s1639_s24  }
   0xf   : > { %s2053_s2 = sld [smem:[#allocation23_spill]] }
  0x10   : > { %p1716_p4 = pnand %p1103_p0, %p185_p2 }
  0x12   : > { %s2051_s28 = scalar_select %p1716_p4, 1, 0 }
  0x13   : > { %p1224_p5 = pneg %p1716_p4 }
  0x15   : > { %p1724_p6 = pnand %p1224_p5, %p2036_p1  ;;  %s1406_s9 = scalar_lea.hbm %s2053_s2, 4096 }
  0x16   : > { %p1407_p7 = scmp.ne.s32.totalorder %s2053_s2, %s1406_s9  ;;  %p1413_p11 = scmp.lt.u32.totalorder %s1406_s9, %s2053_s2 }
  0x17   : > { %s2052_s29 = scalar_select %p1724_p6, 1, 0 }
  0x18   : > { %p1739_p8 = pneg %p1724_p6 }
  0x1a   : > { %p1409_p9 = pnand %p1739_p8, %p1407_p7 }
  0x1c   : > { %p1410_p10 = pneg %p1409_p9 }
  0x1e   : > { %p1415_p12 = pnand %p1413_p11, %p1410_p10 }
  0x20   : > { %1418 = shalt.err (!%p1415_p12)
}
  0x21   : > { %s1419_s15 = scalar_lea.vmem %s220_s26, 4096  ;;  %p1427_p5 = scmp.lt.s32.totalorder %s220_s26, %s220_s26 }
  0x22   : > { %p1420_p13 = scmp.ne.s32.totalorder %s220_s26, %s1419_s15  ;;  %p1428_p3 = scmp.lt.s32.totalorder %s1419_s15, %s1419_s15 }
  0x24   : > { %p1422_p0 = pnand %p1420_p13, %p1739_p8  ;;  %p1429_p1 = por %p1428_p3, %p1427_p5 }
  0x26   : > { %p1423_p2 = pneg %p1422_p0 }
  0x28   : > { %p1430_p4 = pnand %p1429_p1, %p1423_p2 }
  0x2a   : > { %1433 = shalt.err (!%p1430_p4)
}
  0x2b   : > { %s2038_s16 = smov 128   ;;  %s2042_s17 = smov 8  }
  0x2c   : > { %1233 = dma.hbm_to_vmem [thread:$0]  (!%p1724_p6), %s2053_s2, 4096, %s220_s26, [#allocation9], %s2038_s16, %s2038_s16, %s2042_s17  }
  0x2d   : > { %s111_s20 = ssub.s32 %s1639_s24, %s1729_s30  ;;  %s114_s25 = sadd.s32 1, %s1635_s23 }
  0x2e   : > { %p112_p1 = scmp.eq.s32.totalorder %s111_s20, 0  ;;  %p121_p3 = scmp.ne.s32.totalorder %s1635_s23, %s1631_s22 }
  0x2f   : > { %p122_p4 = scmp.eq.s32.totalorder %s1639_s24, 0  ;;  %p127_p7 = scmp.ne.s32.totalorder %s1631_s22, %s1627_s21 }
  0x30   : > { %s1767_s7 = scalar_select %p112_p1, %s1635_s23, %s114_s25  }
  0x31   : > { %p123_p9 = por %p122_p4, %p121_p3  ;;  %p2056_p10 = scmp.eq.s32.totalorder %s1710_s27, 0 }
  0x32   : > { %2055 = sst [smem:[#allocation21_spill]] %s1767_s7  ;;  %p1248_p12 = scmp.lt.s32.totalorder %s1639_s24, 8 }
  0x33   : > { %p1771_p11 = por %p2056_p10, %p127_p7  ;;  %s246_s9 = sand.u32 1, %s1639_s24  }
  0x34   : > { %s248_s10 = sand.u32 1, %s1635_s23   ;;  %s1196_s13 = sshll.u32 %s1639_s24, 5 }
  0x35   : > { %s2057_s8 = scalar_select %p1771_p11, 1, 0 }
  0x36   : > { %s1109_s11 = sshll.u32 %s248_s10, 1  ;;  %s2058_s4 = sld [smem:[#allocation24_spill]] }
  0x37   : > { %s250_s21 = scalar_lea.vmem [#allocation11], %s1109_s11  ;;  %p1784_p13 = pnand %p1248_p12, %p123_p9 }
  0x38   : > { %s258_s18 = sshll.u32 %s250_s21, 4  ;;  %s1790_s20 = smul.u32 48, %s248_s10  ;;  %s1788_s18 = int_to_ptr.vmem [resolvable:$true] %s258_s18 }
  0x39   : > { %s2059_s19 = scalar_select %p1784_p13, 1, 0 }
  0x3a   : > { %s1792_s25 = scalar_lea.sflag [#allocation12], %s246_s9  ;;  %p2044_p2 = pneg %p1784_p13 }
  0x3c   : > { %s1782_s15 = scalar_lea.hbm %s2058_s4, %s1196_s13  ;;  %s1439_s14 = scalar_lea.hbm %s2058_s4, 256 }
  0x3d   : > { %s1434_s13 = scalar_lea.hbm %s1782_s15, 32  ;;  %p1440_p3 = scmp.lt.u32.totalorder %s1782_s15, %s2058_s4 }
  0x3e   : > { %p1435_p0 = scmp.ne.s32.totalorder %s1782_s15, %s1434_s13  ;;  %p1441_p4 = scmp.lt.u32.totalorder %s1439_s14, %s1434_s13 }
  0x3f   : > { %p1443_p9 = scmp.lt.u32.totalorder %s1434_s13, %s1782_s15 }
  0x40   : > { %p1437_p5 = pnand %p2044_p2, %p1435_p0  ;;  %p1442_p7 = por %p1441_p4, %p1440_p3 }
  0x42   : > { %p1438_p1 = pneg %p1437_p5  ;;  %p1444_p10 = por %p1443_p9, %p1442_p7 }
  0x44   : > { %p1445_p12 = pnand %p1444_p10, %p1438_p1 }
  0x46   : > { %1448 = shalt.err (!%p1445_p12)
}
  0x47   : > { %s1449_s9 = scalar_lea.vmem %s1788_s18, 32  ;;  %s1644_s10 = smov [#allocation11]  }
  0x48   : > { %p1450_p0 = scmp.ne.s32.totalorder %s1788_s18, %s1449_s9  ;;  %s1454_s11 = sshll.u32 %s1644_s10, 4  ;;  %s1455_s11 = int_to_ptr.vmem [resolvable:$false] %s1454_s11 }
  0x49   : > { %s1456_s16 = scalar_lea.vmem %s1455_s11, 64  ;;  %p1457_p6 = scmp.lt.s32.totalorder %s1788_s18, %s1455_s11 }
  0x4a   : > { %p1452_p5 = pnand %p1450_p0, %p2044_p2  ;;  %p1458_p3 = scmp.lt.s32.totalorder %s1456_s16, %s1449_s9 }
  0x4c   : > { %p1453_p11 = pneg %p1452_p5  ;;  %p1459_p4 = por %p1458_p3, %p1457_p6 }
  0x4e   : > { %p1460_p7 = pnand %p1459_p4, %p1453_p11 }
  0x50   : > { %1463 = shalt.err (!%p1460_p7)
}
  0x51   : > { %1240 = dma.hbm_to_vmem [thread:$0]  (!%p1784_p13), %s1782_s15, 32, %s1788_s18, %s1792_s25  }
  0x52   : > { %s1645_s13 = smov [#allocation7]   ;;  %s269_s14 = scalar_lea.vmem [#allocation13], %s1790_s20 }
  0x53   : > { %s206_s26 = sshll.u32 %s1645_s13, 4  ;;  %s1821_s21 = sshll.u32 %s269_s14, 4  ;;  %s1823_s26 = int_to_ptr.vmem [resolvable:$true] %s206_s26  ;;  %s1869_s21 = int_to_ptr.vmem [resolvable:$true] %s1821_s21 }
  0x54   : > { %s2060_s0 = sld [smem:[#allocation22_spill]] }
  0x5a   : > { %s1464_s11 = scalar_lea.hbm %s2060_s0, 128 }
  0x5b   : > { %p1465_p6 = scmp.ne.s32.totalorder %s2060_s0, %s1464_s11  ;;  %p1471_p9 = scmp.lt.u32.totalorder %s1464_s11, %s2060_s0 }
  0x5d   : > { %p1467_p11 = pnand %p1465_p6, %p1739_p8 }
  0x5f   : > { %p1468_p1 = pneg %p1467_p11 }
  0x61   : > { %p1473_p10 = pnand %p1471_p9, %p1468_p1 }
  0x63   : > { %1476 = shalt.err (!%p1473_p10)
}
  0x64   : > { %s1646_s18 = smov [#allocation3]   ;;  %p2061_p12 = scmp.ne.s32.totalorder %s2052_s29, 0 }
  0x65   : > { %s1477_s10 = scalar_lea.hbm %s2030_s1, 768 }
  0x66   : > { %1227 = dma.hbm_to_smem (!%p2061_p12), %s2060_s0, 128, %s1646_s18, [#allocation6]  }
  0x67   : > { %p1478_p0 = scmp.ne.s32.totalorder %s2030_s1, %s1477_s10  ;;  %p1484_p4 = scmp.lt.u32.totalorder %s1477_s10, %s2030_s1 }
  0x69   : > { %p1480_p5 = pnand %p1478_p0, %p1739_p8 }
  0x6b   : > { %p1481_p3 = pneg %p1480_p5 }
  0x6d   : > { %p1486_p7 = pnand %p1484_p4, %p1481_p3 }
  0x6f   : > { %1489 = shalt.err (!%p1486_p7)
}
  0x70   : > { %s1490_s15 = scalar_lea.vmem %s1823_s26, 768  ;;  %p1498_p9 = scmp.lt.s32.totalorder %s1823_s26, %s1823_s26 }
  0x71   : > { %p1491_p6 = scmp.ne.s32.totalorder %s1823_s26, %s1490_s15  ;;  %p1499_p10 = scmp.lt.s32.totalorder %s1490_s15, %s1490_s15 }
  0x73   : > { %p1493_p11 = pnand %p1491_p6, %p1739_p8  ;;  %p1500_p0 = por %p1499_p10, %p1498_p9 }
  0x75   : > { %p1494_p1 = pneg %p1493_p11 }
  0x77   : > { %p1501_p5 = pnand %p1500_p0, %p1494_p1 }
  0x79   : > { %1504 = shalt.err (!%p1501_p5)
}
  0x7a   : > { %s1647_s18 = smov 256   ;;  %s1648_s20 = smov 16  }
  0x7b   : > { %1230 = dma.hbm_to_vmem [thread:$0]  (!%p2061_p12), %s2030_s1, 768, %s1823_s26, [#allocation4], %s1647_s18, %s1647_s18, %s1648_s20  }
  0x7c   : > { %s1198_s17 = smul.u32 768, %s1639_s24  ;;  %s1649_s10 = smov [#allocation10]  }
  0x7d   : > { %s232_s9 = sshll.u32 %s1649_s10, 4  ;;  %s1505_s4 = scalar_lea.hbm %s2032_s3, 4096  ;;  %s233_s9 = int_to_ptr.vmem [resolvable:$true] %s232_s9 }
  0x7e   : > { %s1874_s11 = scalar_lea.hbm %s2034_s5, %s1198_s17  ;;  %p1506_p3 = scmp.ne.s32.totalorder %s2032_s3, %s1505_s4 }
  0x7f   : > { %p1512_p6 = scmp.lt.u32.totalorder %s1505_s4, %s2032_s3 }
  0x80   : > { %p1508_p4 = pnand %p1506_p3, %p1739_p8 }
  0x82   : > { %p1509_p7 = pneg %p1508_p4 }
  0x84   : > { %p1514_p11 = pnand %p1512_p6, %p1509_p7 }
  0x86   : > { %1517 = shalt.err (!%p1514_p11)
}
  0x87   : > { %s1518_s13 = scalar_lea.vmem %s233_s9, 4096  ;;  %p1526_p0 = scmp.lt.s32.totalorder %s233_s9, %s233_s9 }
  0x88   : > { %p1519_p1 = scmp.ne.s32.totalorder %s233_s9, %s1518_s13  ;;  %p1527_p5 = scmp.lt.s32.totalorder %s1518_s13, %s1518_s13 }
  0x8a   : > { %p1521_p9 = pnand %p1519_p1, %p1739_p8  ;;  %p1528_p2 = por %p1527_p5, %p1526_p0 }
  0x8c   : > { %p1522_p10 = pneg %p1521_p9 }
  0x8e   : > { %p1529_p13 = pnand %p1528_p2, %p1522_p10 }
  0x90   : > { %1532 = shalt.err (!%p1529_p13)
}
  0x91   : > { %s2062_s0 = smov 8   ;;  %s2063_s23 = smov 128  }
  0x92   : > { %1236 = dma.hbm_to_vmem [thread:$0]  (!%p2061_p12), %s2032_s3, 4096, %s233_s9, [#allocation9], %s2063_s23, %s2063_s23, %s2062_s0  }
  0x93   : > { %s1533_s12 = scalar_lea.hbm %s1874_s11, 768  ;;  %p2064_p3 = scmp.ne.s32.totalorder %s2059_s19, 0 }
  0x94   : > { %p1534_p8 = scmp.ne.s32.totalorder %s1874_s11, %s1533_s12  ;;  %s1538_s17 = scalar_lea.hbm %s2034_s5, 6144 }
  0x95   : > { %p2065_p4 = pneg %p2064_p3  ;;  %p1539_p7 = scmp.lt.u32.totalorder %s1874_s11, %s2034_s5 }
  0x96   : > { %p1540_p6 = scmp.lt.u32.totalorder %s1538_s17, %s1533_s12  ;;  %p1542_p1 = scmp.lt.u32.totalorder %s1533_s12, %s1874_s11 }
  0x97   : > { %p1536_p2 = pnand %p1534_p8, %p2065_p4 }
  0x98   : > { %p1541_p11 = por %p1540_p6, %p1539_p7 }
  0x99   : > { %p1537_p13 = pneg %p1536_p2 }
  0x9a   : > { %p1543_p9 = por %p1542_p1, %p1541_p11 }
  0x9c   : > { %p1544_p10 = pnand %p1543_p9, %p1537_p13 }
  0x9e   : > { %1547 = shalt.err (!%p1544_p10)
}
  0x9f   : > { %s1548_s9 = scalar_lea.vmem %s1869_s21, 768  ;;  %p2066_p0 = pmov %p2065_p4 }
  0xa0   : > { %p1549_p12 = scmp.ne.s32.totalorder %s1869_s21, %s1548_s9  ;;  %s1650_s2 = smov [#allocation13]  }
  0xa1   : > { %s1553_s15 = sshll.u32 %s1650_s2, 4  ;;  %s1554_s15 = int_to_ptr.vmem [resolvable:$false] %s1553_s15 }
  0xa2   : > { %p1551_p5 = pnand %p1549_p12, %p2066_p0  ;;  %s1555_s24 = scalar_lea.vmem %s1554_s15, 1536 }
  0xa3   : > { %p1556_p4 = scmp.lt.s32.totalorder %s1869_s21, %s1554_s15  ;;  %p1557_p2 = scmp.lt.s32.totalorder %s1555_s24, %s1548_s9 }
  0xa4   : > { %p1552_p8 = pneg %p1551_p5 }
  0xa5   : > { %p1558_p7 = por %p1557_p2, %p1556_p4 }
  0xa7   : > { %p1559_p6 = pnand %p1558_p7, %p1552_p8 }
  0xa9   : > { %1562 = shalt.err (!%p1559_p6)
}
  0xaa   : > { %1243 = dma.hbm_to_vmem [thread:$0]  (!%p2064_p3), %s1874_s11, 768, %s1869_s21, %s1792_s25, %s1647_s18, %s1647_s18, %s1648_s20  }
  0xab   : > { %p2067_p13 = scmp.ne.s32.totalorder %s2051_s28, 0 }
  0xac   : > { %p2068_p11 = scmp.eq.s32.totalorder (!%p2067_p13), %s1710_s27, 0 }
  0xad   : > { %288 = sbr.rel (%p2067_p13) target bundleno = 764 (0x2fc), region = 44 }
  0xb4   : > { %1606 = dma.done.wait (%p2068_p11), [#allocation6], 128   ;;  %p2069_p1 = pmov %p2068_p11 }
  0xb6   : > { %1608 = vsyncadd (%p2069_p1), [#allocation6], 4294967168  ;;  %p2070_p9 = pmov %p2069_p1 }
  0xb7   : > { %p2071_p10 = pmov %p2069_p1 }
  0xb8   : > { %1610 = dma.done.wait (%p2070_p9), [#allocation4], 768  }
  0xb9   : > { %1612 = vsyncadd (%p2071_p10), [#allocation4], 4294966528  ;;  %p2072_p12 = pmov %p2069_p1 }
  0xba   : > { %p2073_p3 = pmov %p2069_p1 }
  0xbb   : > { %1614 = dma.done.wait (%p2072_p12), [#allocation9], 8192  }
  0xbc   : > { %1616 = vsyncadd (%p2073_p3), [#allocation9], 4294959104  ;;  %s306_s28 = sand.u32 1, %s1710_s27   ;;  %s308_s19 = sand.u32 1, %s1631_s22  }
  0xbd   : > { %s1940_s25 = sshll.u32 %s308_s19, 1  ;;  %s307_s21 = scalar_lea.sflag [#allocation12], %s306_s28 }
  0xbe   : > { %s310_s18 = scalar_lea.vmem [#allocation11], %s1940_s25  ;;  %p2074_p0 = scmp.ne.s32.totalorder %s2057_s8, 0 }
  0xc0   : > { %1618 = dma.done.wait (%p2074_p0), %s307_s21, 800  }
  0xc1   : > { %1620 = vsyncadd (%p2074_p0), %s307_s21, 4294966496  ;;  %s1199_s20 = smul.u32 48, %s308_s19 }
  0xc3   : > { %s1947_s11 = scalar_lea.vmem [#allocation13], %s1199_s20 }
  0xc4   : > { %324 = sfence }
  0xc5   : > { %p2075_p5 = scmp.ne.s32.totalorder %s1710_s27, 0 }
  0xc6   : > { %v353_v0 = vld [vmem:[#allocation7] sm:$0xff] (!%p2075_p5)  ;;  %v354_v1 = vld [vmem:[#allocation7 + $0x8] sm:$0xff] (!%p2075_p5)  ;;  %v355_v2 = vld [vmem:[#allocation7 + $0x10] sm:$0xff] (!%p2075_p5) }
  0xc7   : > { %352 = sbr.rel (%p2075_p5) target bundleno = 206 (0xce), region = 72  ;;  %359 = vst [vmem:[#allocation2] sm:$0xff] (!%p2075_p5), %v353_v0  ;;  %360 = vst [vmem:[#allocation2 + $0x8] sm:$0xff] (!%p2075_p5), %v354_v1  ;;  %v356_v3 = vld [vmem:[#allocation7 + $0x18] sm:$0xff] (!%p2075_p5)  ;;  %v357_v4 = vld [vmem:[#allocation7 + $0x20] sm:$0xff] (!%p2075_p5) }
  0xc8   : > { %361 = vst [vmem:[#allocation2 + $0x10] sm:$0xff] (!%p2075_p5), %v355_v2  ;;  %v358_v5 = vld [vmem:[#allocation7 + $0x28] sm:$0xff] (!%p2075_p5)  ;;  %362 = vst [vmem:[#allocation2 + $0x18] sm:$0xff] (!%p2075_p5), %v356_v3 }
  0xc9   : > { %363 = vst [vmem:[#allocation2 + $0x20] sm:$0xff] (!%p2075_p5), %v357_v4  ;;  %364 = vst [vmem:[#allocation2 + $0x28] sm:$0xff] (!%p2075_p5), %v358_v5 }
  0xce PF: > { %v1298_v6 = vld [vmem:[#allocation8 + $0x4] ss:$8 sps:$4 sm:$0xff]   ;;  %v1300_v7 = vld [vmem:[#allocation8] ss:$8 sps:$4 sm:$0xff]   ;;  %v1301_v8 = vld [vmem:[#allocation8 + $0x14] ss:$8 sps:$4 sm:$0xff]  }
  0xcf   : > { %579 = vmatprep.subr.bf16.mxu0 %v1298_v6  ;;  %v1303_v9 = vld [vmem:[#allocation8 + $0x10] ss:$8 sps:$4 sm:$0xff]   ;;  %v1304_v10 = vld [vmem:[#allocation8 + $0x24] ss:$8 sps:$4 sm:$0xff]   ;;  %v1306_v11 = vld [vmem:[#allocation8 + $0x20] ss:$8 sps:$4 sm:$0xff]  }
  0xd0   : > { %580 = vmatpush1.bf16.msra.mxu0 %v1300_v7  ;;  %v1307_v12 = vld [vmem:[#allocation8 + $0x34] ss:$8 sps:$4 sm:$0xff]   ;;  %v1309_v13 = vld [vmem:[#allocation8 + $0x30] ss:$8 sps:$4 sm:$0xff]   ;;  %v1310_v14 = vld [vmem:[#allocation8 + $0x44] ss:$8 sps:$4 sm:$0xff]  }
  0xd1   : > { %581 = vmatprep.subr.bf16.mxu0 %v1301_v8  ;;  %v1312_v15 = vld [vmem:[#allocation8 + $0x40] ss:$8 sps:$4 sm:$0xff]   ;;  %v1313_v16 = vld [vmem:[#allocation8 + $0x54] ss:$8 sps:$4 sm:$0xff]   ;;  %v1315_v17 = vld [vmem:[#allocation8 + $0x50] ss:$8 sps:$4 sm:$0xff]  }
  0xd2   : > { %v1316_v18 = vld [vmem:[#allocation8 + $0x64] ss:$8 sps:$4 sm:$0xff]   ;;  %v1953_v20 = vld [vmem:[#allocation2 + $0x18] sm:$0xff]  ;;  %v1318_v21 = vld [vmem:[#allocation8 + $0x60] ss:$8 sps:$4 sm:$0xff]   ;;  %s1184_s8 = sshll.u32 %s1710_s27, 7 }
  0xd3   : > { %v1951_v19 = vld [vmem:[#allocation2 + $0x8] sm:$0xff]  ;;  %v1319_v23 = vld [vmem:[#allocation8 + $0x74] ss:$8 sps:$4 sm:$0xff]   ;;  %v1321_v27 = vld [vmem:[#allocation8 + $0x70] ss:$8 sps:$4 sm:$0xff]   ;;  %s884_s26 = sld [smem:[#allocation3 + %s1184_s8]] }
  0xd4   : > { %582 = vmatpush1.bf16.msra.mxu0 %v1303_v9  ;;  %v372_v22 = vpack.c.bf16 %v1953_v20, %v1951_v19  ;;  %v1346_v24 = vld [vmem:[#allocation10 + $0x4] ss:$8 sps:$4 sm:$0xff]   ;;  %v1348_v25 = vld [vmem:[#allocation10] ss:$8 sps:$4 sm:$0xff]   ;;  %v1349_v26 = vld [vmem:[#allocation10 + $0x14] ss:$8 sps:$4 sm:$0xff]  }
  0xd5   : > { %583 = vmatprep.subr.bf16.mxu0 %v1304_v10  ;;  %832 = vmatprep.subr.bf16.mxu1 %v1346_v24  ;;  %v1351_v28 = vld [vmem:[#allocation10 + $0x10] ss:$8 sps:$4 sm:$0xff]   ;;  %v1322_v29 = vld [vmem:[#allocation8 + $0x84] ss:$8 sps:$4 sm:$0xff]   ;;  %v1324_v31 = vld [vmem:[#allocation8 + $0x80] ss:$8 sps:$4 sm:$0xff]  }
  0xd6   : > { %611 = vmatprep.mubr.bf16.mxu0 %v372_v22  ;;  %833 = vmatpush1.bf16.msra.mxu1 %v1348_v25  ;;  %v1352_v30 = vld [vmem:[#allocation10 + $0x24] ss:$8 sps:$4 sm:$0xff]   ;;  %v1354_v32 = vld [vmem:[#allocation10 + $0x20] ss:$8 sps:$4 sm:$0xff]   ;;  %v1325_v33 = vld [vmem:[#allocation8 + $0x94] ss:$8 sps:$4 sm:$0xff]  }
  0xd7   : > { %834 = vmatprep.subr.bf16.mxu1 %v1349_v26  ;;  %v1355_v34 = vld [vmem:[#allocation10 + $0x34] ss:$8 sps:$4 sm:$0xff]   ;;  %v1327_v35 = vld [vmem:[#allocation8 + $0x90] ss:$8 sps:$4 sm:$0xff]   ;;  %v1328_v37 = vld [vmem:[#allocation8 + $0xa4] ss:$8 sps:$4 sm:$0xff]  }
  0xd8   : > { %584 = vmatpush1.bf16.msra.mxu0 %v1306_v11  ;;  %v1357_v36 = vld [vmem:[#allocation10 + $0x30] ss:$8 sps:$4 sm:$0xff]   ;;  %v1358_v38 = vld [vmem:[#allocation10 + $0x44] ss:$8 sps:$4 sm:$0xff]   ;;  %v1330_v39 = vld [vmem:[#allocation8 + $0xa0] ss:$8 sps:$4 sm:$0xff]  }
  0xd9   : > { %585 = vmatprep.subr.bf16.mxu0 %v1307_v12  ;;  %v1360_v40 = vld [vmem:[#allocation10 + $0x40] ss:$8 sps:$4 sm:$0xff]   ;;  %v1331_v41 = vld [vmem:[#allocation8 + $0xb4] ss:$8 sps:$4 sm:$0xff]   ;;  %v1333_v43 = vld [vmem:[#allocation8 + $0xb0] ss:$8 sps:$4 sm:$0xff]  }
  0xda   : > { %835 = vmatpush1.bf16.msra.mxu1 %v1351_v28  ;;  %v1361_v42 = vld [vmem:[#allocation10 + $0x54] ss:$8 sps:$4 sm:$0xff]   ;;  %v1363_v44 = vld [vmem:[#allocation10 + $0x50] ss:$8 sps:$4 sm:$0xff]   ;;  %v1334_v45 = vld [vmem:[#allocation8 + $0xc4] ss:$8 sps:$4 sm:$0xff]  }
  0xdb   : > { %836 = vmatprep.subr.bf16.mxu1 %v1352_v30  ;;  %v1364_v46 = vld [vmem:[#allocation10 + $0x64] ss:$8 sps:$4 sm:$0xff]   ;;  %v1336_v47 = vld [vmem:[#allocation8 + $0xc0] ss:$8 sps:$4 sm:$0xff]   ;;  %v1337_v49 = vld [vmem:[#allocation8 + $0xd4] ss:$8 sps:$4 sm:$0xff]  }
  0xdc   : > { %586 = vmatpush1.bf16.msra.mxu0 %v1309_v13  ;;  %v1366_v48 = vld [vmem:[#allocation10 + $0x60] ss:$8 sps:$4 sm:$0xff]   ;;  %v1367_v50 = vld [vmem:[#allocation10 + $0x74] ss:$8 sps:$4 sm:$0xff]   ;;  %v1339_v51 = vld [vmem:[#allocation8 + $0xd0] ss:$8 sps:$4 sm:$0xff]  }
  0xdd   : > { %587 = vmatprep.subr.bf16.mxu0 %v1310_v14  ;;  %v1369_v52 = vld [vmem:[#allocation10 + $0x70] ss:$8 sps:$4 sm:$0xff]   ;;  %v1340_v53 = vld [vmem:[#allocation8 + $0xe4] ss:$8 sps:$4 sm:$0xff]   ;;  %v1342_v55 = vld [vmem:[#allocation8 + $0xe0] ss:$8 sps:$4 sm:$0xff]  }
  0xde   : > { %837 = vmatpush1.bf16.msra.mxu1 %v1354_v32  ;;  %v1370_v54 = vld [vmem:[#allocation10 + $0x84] ss:$8 sps:$4 sm:$0xff]   ;;  %v1372_v56 = vld [vmem:[#allocation10 + $0x80] ss:$8 sps:$4 sm:$0xff]   ;;  %v1343_v57 = vld [vmem:[#allocation8 + $0xf4] ss:$8 sps:$4 sm:$0xff]  }
  0xdf   : > { %838 = vmatprep.subr.bf16.mxu1 %v1355_v34  ;;  %v1373_v58 = vld [vmem:[#allocation10 + $0x94] ss:$8 sps:$4 sm:$0xff]   ;;  %v1345_v59 = vld [vmem:[#allocation8 + $0xf0] ss:$8 sps:$4 sm:$0xff]   ;;  %v1957_v60 = vld [vmem:[#allocation2] sm:$0xff]  ;;  %s885_s13 = sadd.s32 1, %s1184_s8 }
  0xe0   : > { %588 = vmatpush1.bf16.msra.mxu0 %v1312_v15  ;;  %v1959_v61 = vld [vmem:[#allocation2 + $0x10] sm:$0xff]  ;;  %v1961_v63 = vld [vmem:[#allocation2 + $0x28] sm:$0xff]  ;;  %v1967_v4 = vld [vmem:[#allocation2 + $0x20] sm:$0xff]  ;;  %s887_s0 = sadd.s32 2, %s1184_s8  ;;  %s886_s23 = sld [smem:[#allocation3 + %s885_s13]] }
  0xe1   : > { %589 = vmatprep.subr.bf16.mxu0 %v1313_v16  ;;  %v1375_v62 = vld [vmem:[#allocation10 + $0x90] ss:$8 sps:$4 sm:$0xff]   ;;  %v1376_v0 = vld [vmem:[#allocation10 + $0xa4] ss:$8 sps:$4 sm:$0xff]   ;;  %v371_v1 = vpack.c.bf16 %v1959_v61, %v1957_v60  ;;  %v374_v2 = vpack.c.bf16 %v1961_v63, %v1961_v63  ;;  %v1378_v3 = vld [vmem:[#allocation10 + $0xa0] ss:$8 sps:$4 sm:$0xff]   ;;  %v373_v5 = vpack.c.bf16 %v1967_v4, %v1967_v4  ;;  %v409_v16 = vlaneseq }
  0xe2   : > { %839 = vmatpush1.bf16.msra.mxu1 %v1357_v36  ;;  %v1379_v6 = vld [vmem:[#allocation10 + $0xb4] ss:$8 sps:$4 sm:$0xff]   ;;  %v1381_v7 = vld [vmem:[#allocation10 + $0xb0] ss:$8 sps:$4 sm:$0xff]   ;;  %v1382_v8 = vld [vmem:[#allocation10 + $0xc4] ss:$8 sps:$4 sm:$0xff]  }
  0xe3   : > { %840 = vmatprep.subr.bf16.mxu1 %v1358_v38  ;;  %v1384_v9 = vld [vmem:[#allocation10 + $0xc0] ss:$8 sps:$4 sm:$0xff]   ;;  %v1385_v10 = vld [vmem:[#allocation10 + $0xd4] ss:$8 sps:$4 sm:$0xff]   ;;  %v1387_v11 = vld [vmem:[#allocation10 + $0xd0] ss:$8 sps:$4 sm:$0xff]  }
  0xe4   : > { %590 = vmatpush1.bf16.msra.mxu0 %v1315_v17  ;;  %v1388_v12 = vld [vmem:[#allocation10 + $0xe4] ss:$8 sps:$4 sm:$0xff]   ;;  %v1390_v13 = vld [vmem:[#allocation10 + $0xe0] ss:$8 sps:$4 sm:$0xff]   ;;  %v1391_v14 = vld [vmem:[#allocation10 + $0xf4] ss:$8 sps:$4 sm:$0xff]  }
  0xe5   : > { %591 = vmatprep.subr.bf16.mxu0 %v1316_v18  ;;  %v1393_v15 = vld [vmem:[#allocation10 + $0xf0] ss:$8 sps:$4 sm:$0xff]   ;;  %v410_v17 = vshrl.u32 %v409_v16, 7  ;;  %s891_s7 = sadd.s32 4, %s1184_s8  ;;  %s889_s4 = sadd.s32 3, %s1184_s8 }
  0xe6   : > { %841 = vmatpush1.bf16.msra.mxu1 %v1360_v40  ;;  %s888_s12 = sld [smem:[#allocation3 + %s887_s0]]  ;;  %p1191_p8 = scmp.ne.s32.totalorder %s1710_s27, 7 }
  0xe7   : > { %842 = vmatprep.subr.bf16.mxu1 %v1361_v42  ;;  %v411_v18 = vsub.s32 0, %v410_v17  ;;  %v415_v22 = vsub.s32 1, %v410_v17  ;;  %s892_s14 = sld [smem:[#allocation3 + %s891_s7]]  ;;  %v947_v17 = vld [vmem:[%s1947_s11 + $0x10] sm:$0xff] }
  0xe8   : > { %592 = vmatpush1.bf16.msra.mxu0 %v1318_v21  ;;  %v407_v21 = vld [vmem:[%s310_s18] sm:$0x3]  ;;  %s890_s29 = sld [smem:[#allocation3 + %s889_s4]] }
  0xe9   : > { %593 = vmatprep.subr.bf16.mxu0 %v1319_v23  ;;  %v412_v23 = vrot.slane %v407_v21, %v411_v18  ;;  %v416_v24 = vrot.slane %v407_v21, %v415_v22 }
  0xea   : > { %843 = vmatpush1.bf16.msra.mxu1 %v1363_v44 }
  0xeb   : > { %844 = vmatprep.subr.bf16.mxu1 %v1364_v46 }
  0xec   : > { %594 = vmatpush1.bf16.msra.mxu0 %v1321_v27 }
  0xed   : > { %595 = vmatprep.subr.bf16.mxu0 %v1322_v29 }
  0xee   : > { %845 = vmatpush1.bf16.msra.mxu1 %v1366_v48 }
  0xef   : > { %846 = vmatprep.subr.bf16.mxu1 %v1367_v50 }
  0xf0   : > { %596 = vmatpush1.bf16.msra.mxu0 %v1324_v31 }
  0xf1   : > { %597 = vmatprep.subr.bf16.mxu0 %v1325_v33 }
  0xf2   : > { %847 = vmatpush1.bf16.msra.mxu1 %v1369_v52 }
  0xf3   : > { %848 = vmatprep.subr.bf16.mxu1 %v1370_v54 }
  0xf4   : > { %598 = vmatpush1.bf16.msra.mxu0 %v1327_v35 }
  0xf5   : > { %599 = vmatprep.subr.bf16.mxu0 %v1328_v37 }
  0xf6   : > { %849 = vmatpush1.bf16.msra.mxu1 %v1372_v56 }
  0xf7   : > { %850 = vmatprep.subr.bf16.mxu1 %v1373_v58 }
  0xf8   : > { %600 = vmatpush1.bf16.msra.mxu0 %v1330_v39 }
  0xf9   : > { %601 = vmatprep.subr.bf16.mxu0 %v1331_v41 }
  0xfa   : > { %851 = vmatpush1.bf16.msra.mxu1 %v1375_v62 }
  0xfb   : > { %852 = vmatprep.subr.bf16.mxu1 %v1376_v0 }
  0xfc   : > { %602 = vmatpush1.bf16.msra.mxu0 %v1333_v43 }
  0xfd   : > { %603 = vmatprep.subr.bf16.mxu0 %v1334_v45 }
  0xfe   : > { %853 = vmatpush1.bf16.msra.mxu1 %v1378_v3  ;;  %v951_v3 = vstv %s892_s14 }
  0xff   : > { %854 = vmatprep.subr.bf16.mxu1 %v1379_v6  ;;  %v932_v6 = vstv %s890_s29 }
 0x100   : > { %604 = vmatpush1.bf16.msra.mxu0 %v1336_v47 }
 0x101   : > { %605 = vmatprep.subr.bf16.mxu0 %v1337_v49  ;;  %v893_v49 = vstv %s884_s26 }
 0x102   : > { %855 = vmatpush1.bf16.msra.mxu1 %v1381_v7 }
 0x103   : > { %856 = vmatprep.subr.bf16.mxu1 %v1382_v8 }
 0x104   : > { %606 = vmatpush1.bf16.msra.mxu0 %v1339_v51 }
 0x105   : > { %607 = vmatprep.subr.bf16.mxu0 %v1340_v53  ;;  %v906_v53 = vstv %s886_s23 }
 0x106   : > { %857 = vmatpush1.bf16.msra.mxu1 %v1384_v9 }
 0x107   : > { %858 = vmatprep.subr.bf16.mxu1 %v1385_v10 }
 0x108   : > { %608 = vmatpush1.bf16.msra.mxu0 %v1342_v55 }
 0x109   : > { %609 = vmatprep.subr.bf16.mxu0 %v1343_v57 }
 0x10a   : > { %859 = vmatpush1.bf16.msra.mxu1 %v1387_v11 }
 0x10b   : > { %860 = vmatprep.subr.bf16.mxu1 %v1388_v12  ;;  %v946_v12 = vld [vmem:[%s1947_s11 + $0x8] sm:$0xff] }
 0x10c   : > { %610 = vmatpush1.bf16.msra.mxu0 %v1345_v59  ;;  %v925_v59 = vstv %s888_s12 }
 0x10d   : > { %v927_v9 = vmul.f32 %v925_v59, %v1951_v19  ;;  %v926_v11 = vmul.f32 %v925_v59, %v1957_v60 }
 0x10e   : > { %861 = vmatpush1.bf16.msra.mxu1 %v1390_v13 }
 0x10f   : > { %612 = vmatmul.mubr.bf16.vlgmr.msra.gmra.mrb[0].mxu0 %v371_v1  ;;  %862 = vmatprep.subr.bf16.mxu1 %v1391_v14  ;;  %v929_v14 = vmul.f32 %v925_v59, %v1953_v20 }
 0x110   : > { %621 = vmatprep.mubr.bf16.mxu0 %v374_v2  ;;  %v945_v2 = vld [vmem:[%s1947_s11] sm:$0xff] }
 0x112   : > { %863 = vmatpush1.bf16.msra.mxu1 %v1393_v15  ;;  %v952_v15 = vmul.f32 %v951_v3, %v945_v2 }
 0x117   : > { %622 = vmatmul.mubr.bf16.gmra.mrb[4].mxu0 %v373_v5 }
 0x1e2   : > { %v613_v25 = vpop.f32.mrb[0].mxu0 }
 0x1e3   : > { %v614_v26 = vadd.f32 %v613_v25, %v412_v23  ;;  %v615_v27 = vpop.f32.mrb[1].mxu0  ;;  %v948_v25 = vld [vmem:[%s1947_s11 + $0x18] sm:$0xff] }
 0x1e4   : > { %v616_v28 = vadd.f32 %v615_v27, %v416_v24  ;;  %v617_v29 = vpop.f32.mrb[2].mxu0 }
 0x1e5   : > { %1394 = vtanh.f32 %v614_v26  ;;  %v618_v30 = vadd.f32 %v617_v29, %v412_v23  ;;  %v619_v31 = vpop.f32.mrb[3].mxu0 }
 0x1e6   : > { %1396 = vtanh.f32 %v616_v28  ;;  %v620_v32 = vadd.f32 %v619_v31, %v416_v24  ;;  %v953_v28 = vmul.f32 %v951_v3, %v946_v12 }
 0x1e7   : > { %1398 = vtanh.f32 %v618_v30 }
 0x1e8   : > { %1400 = vtanh.f32 %v620_v32  ;;  %v954_v32 = vmul.f32 %v951_v3, %v947_v17 }
 0x1ea   : > { %v623_v33 = vpop.f32.mrb[4].mxu0 }
 0x1eb   : > { %v624_v34 = vadd.f32 %v623_v33, %v412_v23  ;;  %v625_v35 = vpop.f32.mrb[5].mxu0 }
 0x1ec   : > { %v626_v36 = vadd.f32 %v625_v35, %v416_v24  ;;  %v627_v37 = vpop.f32.mrb[6].mxu0  ;;  %v928_v24 = vmul.f32 %v925_v59, %v1959_v61 }
 0x1ed   : > { %v628_v38 = vpop.f32.mrb[7].mxu0  ;;  %v955_v37 = vmul.f32 %v951_v3, %v948_v25 }
 0x1ee   : > { %1402 = vtanh.f32 %v626_v36 }
 0x1ef   : > { %v1395_v39 = vpop.eup %1394  ;;  %1404 = vtanh.f32 %v624_v34 }
 0x1f0   : > { %v1397_v40 = vpop.eup %1396 }
 0x1f1   : > { %v1399_v41 = vpop.eup %1398 }
 0x1f2   : > { %v1401_v42 = vpop.eup %1400  ;;  %v636_v43 = vpack.c.bf16 %v1399_v41, %v1395_v39 }
 0x1f3   : > { %v637_v44 = vpack.c.bf16 %v1401_v42, %v1397_v40 }
 0x1f5   : > { %864 = vmatprep.mubr.bf16.mxu1 %v637_v44 }
 0x1f6   : > { %865 = vmatmul.mubr.bf16.vlgmr.msra.gmra.mrb[0].mxu1 %v636_v43  ;;  %v949_v43 = vld [vmem:[%s1947_s11 + $0x20] sm:$0xff] }
 0x1f8   : > { %v1403_v45 = vpop.eup %1402 }
 0x1f9   : > { %v1405_v46 = vpop.eup %1404  ;;  %v639_v47 = vpack.c.bf16 %v1403_v45, %v1403_v45 }
 0x1fa   : > { %v638_v48 = vpack.c.bf16 %v1405_v46, %v1405_v46 }
 0x1fb   : > { %874 = vmatprep.mubr.bf16.mxu1 %v639_v47  ;;  %v930_v47 = vmul.f32 %v925_v59, %v1967_v4 }
 0x1fe   : > { %875 = vmatmul.mubr.bf16.gmra.mrb[4].mxu1 %v638_v48  ;;  %v950_v48 = vld [vmem:[%s1947_s11 + $0x28] sm:$0xff] }
 0x2c9   : > { %v866_v50 = vpop.f32.mrb[0].mxu1 }
 0x2ca   : > { %v894_v51 = vmul.f32 %v893_v49, %v866_v50  ;;  %v868_v52 = vpop.f32.mrb[1].mxu1 }
 0x2cb   : > { %v895_v54 = vmul.f32 %v893_v49, %v868_v52  ;;  %v870_v55 = vpop.f32.mrb[2].mxu1 }
 0x2cc   : > { %v900_v56 = vsub.f32 %v1957_v60, %v894_v51  ;;  %v896_v57 = vmul.f32 %v893_v49, %v870_v55  ;;  %v872_v58 = vpop.f32.mrb[3].mxu1  ;;  %v931_v51 = vmul.f32 %v925_v59, %v1961_v63 }
 0x2cd   : > { %v901_v62 = vsub.f32 %v1951_v19, %v895_v54  ;;  %v897_v0 = vmul.f32 %v893_v49, %v872_v58  ;;  %v956_v54 = vmul.f32 %v951_v3, %v949_v43 }
 0x2ce   : > { %v907_v1 = vmul.f32 %v906_v53, %v900_v56  ;;  %v902_v5 = vsub.f32 %v1959_v61, %v896_v57  ;;  %v957_v56 = vmul.f32 %v951_v3, %v950_v48 }
 0x2cf   : > { %v908_v7 = vmul.f32 %v906_v53, %v901_v62  ;;  %v903_v8 = vsub.f32 %v1953_v20, %v897_v0 }
 0x2d0   : > { %v1185_v10 = vclamps-f32 %v907_v1, 1.0  ;;  %v909_v13 = vmul.f32 %v906_v53, %v902_v5 }
 0x2d1   : > { %v1186_v16 = vclamps-f32 %v908_v7, 1.0  ;;  %v910_v18 = vmul.f32 %v906_v53, %v903_v8  ;;  %v876_v21 = vpop.f32.mrb[4].mxu1 }
 0x2d2   : > { %v933_v22 = vmul.f32 %v1185_v10, %v932_v6  ;;  %v1187_v23 = vclamps-f32 %v909_v13, 1.0  ;;  %v898_v26 = vmul.f32 %v893_v49, %v876_v21  ;;  %v878_v27 = vpop.f32.mrb[5].mxu1 }
 0x2d3   : > { %v934_v19 = vmul.f32 %v1186_v16, %v932_v6  ;;  %v1188_v29 = vclamps-f32 %v910_v18, 1.0  ;;  %v899_v60 = vmul.f32 %v893_v49, %v878_v27  ;;  %v880_v30 = vpop.f32.mrb[6].mxu1 }
 0x2d4   : > { %v939_v31 = vadd.f32 %v933_v22, %v926_v11  ;;  %v935_v20 = vmul.f32 %v1187_v23, %v932_v6  ;;  %v904_v33 = vsub.f32 %v1967_v4, %v898_v26  ;;  %v881_v34 = vpop.f32.mrb[7].mxu1 }
 0x2d5   : > { %v940_v35 = vadd.f32 %v934_v19, %v927_v9  ;;  %v936_v36 = vmul.f32 %v1188_v29, %v932_v6  ;;  %v905_v61 = vsub.f32 %v1961_v63, %v899_v60 }
 0x2d6   : > { %v958_v38 = vadd.f32 %v952_v15, %v939_v31  ;;  %v941_v39 = vadd.f32 %v935_v20, %v928_v24  ;;  %v911_v40 = vmul.f32 %v906_v53, %v904_v33 }
 0x2d7   : > { %v959_v41 = vadd.f32 %v953_v28, %v940_v35  ;;  %v942_v42 = vadd.f32 %v936_v36, %v929_v14  ;;  %v912_v44 = vmul.f32 %v906_v53, %v905_v61 }
 0x2d8   : > { %964 = vst [vmem:[#allocation2] sm:$0xff] %v958_v38  ;;  %v960_v45 = vadd.f32 %v954_v32, %v941_v39  ;;  %v1189_v46 = vclamps-f32 %v911_v40, 1.0  ;;  %974 = vst [vmem:[#allocation14] sm:$0xff] (!%p1191_p8), %v958_v38 }
 0x2d9   : > { %965 = vst [vmem:[#allocation2 + $0x8] sm:$0xff] %v959_v41  ;;  %v961_v49 = vadd.f32 %v955_v37, %v942_v42  ;;  %v1190_v50 = vclamps-f32 %v912_v44, 1.0  ;;  %975 = vst [vmem:[#allocation14 + $0x8] sm:$0xff] (!%p1191_p8), %v959_v41 }
 0x2da   : > { %966 = vst [vmem:[#allocation2 + $0x10] sm:$0xff] %v960_v45  ;;  %v937_v52 = vmul.f32 %v1189_v46, %v932_v6  ;;  %976 = vst [vmem:[#allocation14 + $0x10] sm:$0xff] (!%p1191_p8), %v960_v45 }
 0x2db   : > { %967 = vst [vmem:[#allocation2 + $0x18] sm:$0xff] %v961_v49  ;;  %v938_v55 = vmul.f32 %v1190_v50, %v932_v6  ;;  %973 = sbr.rel (%p1191_p8) target bundleno = 738 (0x2e2), region = 76  ;;  %977 = vst [vmem:[#allocation14 + $0x18] sm:$0xff] (!%p1191_p8), %v961_v49 }
 0x2dc   : > { %v943_v57 = vadd.f32 %v937_v52, %v930_v47 }
 0x2dd   : > { %v944_v58 = vadd.f32 %v938_v55, %v931_v51 }
 0x2de   : > { %v962_v53 = vadd.f32 %v956_v54, %v943_v57 }
 0x2df   : > { %v963_v62 = vadd.f32 %v957_v56, %v944_v58 }
 0x2e0   : > { %968 = vst [vmem:[#allocation2 + $0x20] sm:$0xff] %v962_v53  ;;  %978 = vst [vmem:[#allocation14 + $0x20] sm:$0xff] (!%p1191_p8), %v962_v53 }
 0x2e1   : > { %969 = vst [vmem:[#allocation2 + $0x28] sm:$0xff] %v963_v62  ;;  %979 = vst [vmem:[#allocation14 + $0x28] sm:$0xff] (!%p1191_p8), %v963_v62 }
 0x2e2 PF: > { %p1253_p4 = scmp.eq.s32.totalorder %s1710_s27, 7  ;;  %s1651_s17 = smov [#allocation14]  }
 0x2e3   : > { %s986_s10 = sshll.u32 %s1651_s17, 4  ;;  %s987_s10 = int_to_ptr.vmem [resolvable:$true] %s986_s10 }
 0x2e4   : > { %s1563_s16 = scalar_lea.vmem %s987_s10, 768  ;;  %p1570_p13 = scmp.lt.s32.totalorder %s987_s10, %s987_s10 }
 0x2e5   : > { %p1564_p2 = scmp.ne.s32.totalorder %s987_s10, %s1563_s16  ;;  %p1571_p11 = scmp.lt.s32.totalorder %s1563_s16, %s1563_s16 }
 0x2e7   : > { %p1565_p7 = pnand %p1564_p2, %p1253_p4  ;;  %p1572_p1 = por %p1571_p11, %p1570_p13 }
 0x2e9   : > { %p1566_p6 = pneg %p1565_p7 }
 0x2eb   : > { %p1573_p9 = pnand %p1572_p1, %p1566_p6 }
 0x2ed   : > { %1576 = shalt.err (!%p1573_p9)
}
 0x2ee   : > { %s1577_s15 = scalar_lea.hbm %s2035_s6, 768 }
 0x2ef   : > { %p1578_p10 = scmp.ne.s32.totalorder %s2035_s6, %s1577_s15  ;;  %p1583_p0 = scmp.lt.u32.totalorder %s1577_s15, %s2035_s6 }
 0x2f1   : > { %p1579_p12 = pnand %p1578_p10, %p1253_p4 }
 0x2f3   : > { %p1580_p3 = pneg %p1579_p12 }
 0x2f5   : > { %p1585_p5 = pnand %p1583_p0, %p1580_p3 }
 0x2f7   : > { %1588 = shalt.err (!%p1585_p5)
}
 0x2f8   : > { %s1652_s21 = smov 256   ;;  %s1653_s18 = smov 16  }
 0x2f9   : > { %1221 = dma.vmem_to_hbm [thread:$0]  (%p1253_p4), %s987_s10, 768, %s2035_s6, [#allocation5], %s1652_s21, %s1652_s21, %s1653_s18  }
 0x2fa   : > { %1622 = dma.done.wait (%p1253_p4), [#allocation5], 768  }
 0x2fb   : > { %1624 = vsyncadd (%p1253_p4), [#allocation5], 4294966528 }
 0x2fc PF: > { %s2076_s8 = sld [smem:[#allocation20_spill]]  ;;  %s2077_s23 = sld [smem:[#allocation21_spill]] }
 0x2fd   : > { %p20_p8 = scmp.ge.s32.totalorder %s1729_s30, 10   ;;  %s2078_s21 = smov %s1631_s22 }
 0x2fe   : > { %s2080_s24 = smov %s1729_s30 }
 0x2ff   :  { %22 = sbr.rel (!%p20_p8) target bundleno = 11 (0xb), region = 118 }
 0x302   : > { %s2079_s22 = smov %s2076_s8 }
 0x306   :  { %1002 = vsyncpa [#allocation4], 1 }
 0x307   :  { %1004 = vsyncpa [#allocation4 + $0x1], 1 }
 0x308   :  { %1005 = vsyncpa [#allocation9], 1 }
 0x309   :  { %1006 = vsyncpa [#allocation12], 1 }
 0x30a   :  { %1008 = vsyncpa [#allocation12 + $0x1], 1 }
 0x30b   :  { %1009 = vsyncpa [#allocation5], 1 }
 0x30c   :  { %1011 = vsyncpa [#allocation5 + $0x1], 1 }
 0x30d   :  { %1012 = vsyncpa [#allocation6], 1 }
 0x30e   :  { %1014 = vsyncpa [#allocation6 + $0x1], 1 }

</bundles_post_ra>
